<compile_context>
chip_gen: v7x
topology: tpu7x:2x2x1
jax: 0.10.0
libtpu: 0.0.40
codegen_flags: <defaults>
</compile_context>

<pallas_src>
import functools
import math

import numpy as np
import jax
import jax.numpy as jnp
from jax.experimental import pallas as pl
from jax.experimental.pallas import tpu as pltpu


def _round_up(x, m):
    return ((x + m - 1) // m) * m


# ----------------------------------------------------------------------------
# Pallas kernel: one (batch, anchor-tile) grid step.
# ----------------------------------------------------------------------------
def _w2v2_loss_kernel(ctx_ref, fhat_ref, negmask_ref, out_ref, *,
                      inv_softmax_weight, matmul_dtype):
    """ctx_ref: (1,TILE_T,C) raw anchors; fhat_ref: (1,TIME_PAD,C) unit feature
    rows (resident per batch); negmask_ref: (1,TILE_T,TIME_PAD) int8 {0,1};
    out_ref: (1,1,1,1) partial loss for this (batch, tile)."""
    tt = pl.program_id(1)
    tile_t = ctx_ref.shape[1]

    ctx = ctx_ref[0].astype(jnp.float32)          # (TILE_T, C)
    fhat = fhat_ref[0]                            # (TIME_PAD, C) pre-normalized
    negf = negmask_ref[0].astype(jnp.float32)     # (TILE_T, TIME_PAD)

    # Anchor normalization (rsqrt on EUP); temperature folded into the same
    # (TILE_T, 1) multiplier -> no full-width rescale of the similarity matrix.
    inv_c = jax.lax.rsqrt(
        jnp.maximum(jnp.sum(ctx * ctx, axis=1, keepdims=True), 1e-30))
    chat_f32 = ctx * (inv_c * inv_softmax_weight)            # (TILE_T, C)
    chat = chat_f32.astype(matmul_dtype)

    # All-pairs temperature-scaled cosine similarity on the MXU.
    sim = jax.lax.dot_general(
        chat, fhat, (((1,), (1,)), ((), ())),
        preferred_element_type=jnp.float32)                  # (TILE_T, TIME_PAD)

    # Positive logit: row-wise dot with the matching feature rows sliced from
    # the resident slab (O(TILE_T*C), no iota diagonal mask over the matrix).
    start = pl.multiple_of(tt * tile_t, tile_t)
    fpos = fhat_ref[0, pl.ds(start, tile_t), :].astype(jnp.float32)   # (TILE_T, C)
    pos = jnp.sum(chat_f32 * fpos, axis=1, keepdims=True)             # (TILE_T, 1)

    # Bounded-logit log-sum-exp: |logit| <= 1/softmax_weight (compile-time
    # constant) replaces the per-row masked max.
    m = inv_softmax_weight
    neg_sumexp = jnp.sum(jnp.exp(sim - m) * negf, axis=1, keepdims=True)
    sumexp = jnp.exp(pos - m) + neg_sumexp
    lse = m + jnp.log(sumexp)

    # Padded anchor rows have an all-zero negmask row -> exactly zero loss.
    loss_t = jnp.where(neg_sumexp > 0.0, lse - pos, 0.0)     # (TILE_T, 1)
    out_ref[0, 0] = jnp.sum(loss_t, keepdims=True)           # (1, 1)


def _fused_contrastive_loss(ctx_all, fhat_all, negmask_all, *, tile_t,
                            softmax_weight, matmul_dtype):
    """ctx_all/fhat_all: (B, TIME_PAD, C); negmask_all: (B, TIME_PAD, TIME_PAD) int8."""
    B, time_pad, C = ctx_all.shape
    n_tiles = time_pad // tile_t

    kernel = functools.partial(
        _w2v2_loss_kernel,
        inv_softmax_weight=float(1.0 / softmax_weight),
        matmul_dtype=matmul_dtype)

    # VMEM budget: double-buffered blocks + f32 temporaries; only raise the
    # scoped limit when the 32 MiB default would be exceeded (matters on v7x).
    dsize = jnp.dtype(matmul_dtype).itemsize
    est = (2 * tile_t * C * dsize           # ctx tiles
           + 2 * time_pad * C * dsize       # resident feature slab
           + 2 * tile_t * time_pad          # int8 negmask tiles
           + 8 * tile_t * time_pad * 4      # sim / exp f32 temporaries
           + (1 << 16))
    cp_kwargs = dict(dimension_semantics=("parallel", "parallel"))
    if est > (32 << 20):
        cp_kwargs["vmem_limit_bytes"] = int(min(est, 100 << 20))

    per_tile = pl.pallas_call(
        kernel,
        out_shape=jax.ShapeDtypeStruct((B, n_tiles, 1, 1), jnp.float32),
        grid=(B, n_tiles),
        in_specs=[
            # anchor tile of this batch
            pl.BlockSpec((1, tile_t, C), lambda b, t: (b, t, 0)),
            # full pre-normalized feature slab of this batch (resident across tiles)
            pl.BlockSpec((1, time_pad, C), lambda b, t: (b, 0, 0)),
            # int8 negative-selection mask tile
            pl.BlockSpec((1, tile_t, time_pad), lambda b, t: (b, t, 0)),
        ],
        out_specs=pl.BlockSpec((1, 1, 1, 1), lambda b, t: (b, t, 0, 0)),
        compiler_params=pltpu.CompilerParams(**cp_kwargs),
    )(ctx_all, fhat_all, negmask_all)
    return jnp.sum(per_tile)


# ----------------------------------------------------------------------------
# Module-equivalent wrapper.
# ----------------------------------------------------------------------------
class Wav2Vec2LossPallas:
    def __init__(self, k_steps, num_neg, feat_dim, softmax_weight, param_key,
                 compute_dtype=jnp.bfloat16, time_tile=None):
        self.k_steps = k_steps
        self.num_neg = num_neg
        self.feat_dim = feat_dim
        self.softmax_weight = softmax_weight
        # bfloat16 default: halves HBM feature traffic and is the native MXU
        # operand; norms / exp / LSE stay f32 inside the kernel.  Pass float32
        # for bit-comparable checks against an f32 reference.
        self.compute_dtype = compute_dtype
        self.time_tile = time_tile   # None -> per-generation auto (256 v6e/v7x, 128 v5e)
        # proj_steps Linear layers exist in the reference __init__ but are NEVER
        # used in forward(); initialized only for parameter-shape parity.
        self.proj_steps = []
        bound = 1.0 / math.sqrt(feat_dim)
        key = param_key
        for _ in range(k_steps):
            key, wk, bk = jax.random.split(key, 3)
            W = jax.random.uniform(wk, (feat_dim, feat_dim),
                                   minval=-bound, maxval=bound, dtype=jnp.float32)
            b = jax.random.uniform(bk, (feat_dim,),
                                   minval=-bound, maxval=bound, dtype=jnp.float32)
            self.proj_steps.append((W, b))

    def __call__(self, feat_enc, feat_context, mask, *, sample_key):
        return self.compute_contrastive_loss(feat_enc, feat_context, mask,
                                             sample_key=sample_key)

    def _pick_time_tile(self):
        if self.time_tile is not None:
            return self.time_tile
        try:
            kind = jax.devices()[0].device_kind.lower()
        except Exception:
            return 128
        # v6e / v7x: 256-wide MXU -> 256-row anchor tiles; v5e & older stay at 128.
        return 256 if ("v6" in kind or "v7" in kind) else 128

    # --- host-side glue (dynamic shapes + RNG; no Pallas equivalent) ---------
    def _gather_and_sample(self, quantized, context_output, mask, sample_key):
        """Per batch: gather masked rows and sample negative indices (vectorized)."""
        # TODO(synk): boolean-mask gather (dynamic per-batch length) and
        # without-replacement sampling stay on the host/XLA side.
        B, C, T = quantized.shape
        mask_np = np.asarray(mask)
        per_batch = []
        key = sample_key
        for b in range(B):
            idx = np.nonzero(mask_np[b])[0]
            time = int(idx.shape[0])
            key, sub = jax.random.split(key)
            if time < 2:
                per_batch.append(None)       # no negatives possible
                continue
            idx_j = jnp.asarray(idx, dtype=jnp.int32)
            feat_b = jnp.take(jnp.transpose(quantized[b]), idx_j, axis=0)       # (time, C)
            ctx_b = jnp.take(jnp.transpose(context_output[b]), idx_j, axis=0)   # (time, C)
            # Uniform without replacement, excluding self: random row ordering via
            # argsort of uniforms, self pushed past the end; n_neg clamped so the
            # self index can never be sampled even when num_neg >= time - 1.
            n_neg = min(self.num_neg, time - 1)
            u = jax.random.uniform(sub, (time, time))
            u = u + jnp.eye(time, dtype=u.dtype) * 2.0
            neg_idx = jnp.argsort(u, axis=1)[:, :n_neg].astype(jnp.int32)
            per_batch.append((ctx_b, feat_b, neg_idx))
        return per_batch

    def compute_contrastive_loss(self, quantized, context_output, mask, *, sample_key):
        per_batch = self._gather_and_sample(quantized, context_output, mask, sample_key)
        live = [p for p in per_batch if p is not None]
        if not live:
            return jnp.float32(0.0)

        max_time = max(p[0].shape[0] for p in live)
        tile_t = min(self._pick_time_tile(), _round_up(max_time, 8))   # multiple of 8
        time_pad = _round_up(max_time, tile_t)

        ctx_list, fhat_list, mask_list = [], [], []
        for ctx_b, feat_b, neg_idx in live:
            time = ctx_b.shape[0]
            pad = time_pad - time
            # Pre-normalize feature rows once (slab is resident across all anchor
            # tiles in the kernel -> no redundant per-tile re-normalization).
            fhat_b = feat_b * jax.lax.rsqrt(
                jnp.maximum(jnp.sum(feat_b * feat_b, axis=1, keepdims=True), 1e-30))
            ctx_list.append(jnp.pad(ctx_b, ((0, pad), (0, 0))))
            fhat_list.append(jnp.pad(fhat_b, ((0, pad), (0, 0))))
            # int8 {0,1} selection mask built by scatter (no one_hot blow-up).
            rows = jnp.arange(time)[:, None]
            nm = jnp.zeros((time, time_pad), dtype=jnp.int8).at[rows, neg_idx].set(1)
            mask_list.append(jnp.pad(nm, ((0, pad), (0, 0))))

        ctx_all = jnp.stack(ctx_list).astype(self.compute_dtype)
        fhat_all = jnp.stack(fhat_list).astype(self.compute_dtype)
        negmask_all = jnp.stack(mask_list)

        return _fused_contrastive_loss(
            ctx_all, fhat_all, negmask_all, tile_t=tile_t,
            softmax_weight=self.softmax_weight, matmul_dtype=self.compute_dtype)


# ----------------------------------------------------------------------------
# Pure-JAX reference (same gathered rows & negative samples) for correctness.
# ----------------------------------------------------------------------------
def _reference_loss(per_batch, softmax_weight):
    total = jnp.float32(0.0)
    for p in per_batch:
        if p is None:
            continue
        ctx_b, feat_b, neg_idx = p
        neg_feat = feat_b[neg_idx]                                   # (time, n_neg, C)
        c_norm = jnp.linalg.norm(ctx_b, axis=1, keepdims=True)
        f_norm = jnp.linalg.norm(feat_b, axis=1, keepdims=True)
        n_norm = jnp.linalg.norm(neg_feat, axis=2)
        pos = jnp.sum(ctx_b * feat_b, axis=1, keepdims=True) / (c_norm * f_norm)
        negs = jnp.sum(ctx_b[:, None, :] * neg_feat, axis=2) / (c_norm * n_norm)
        sims = jnp.concatenate([pos, negs], axis=1) / softmax_weight
        logp = jax.nn.log_softmax(sims, axis=1)
        total = total + jnp.sum(-logp[:, 0])
    return total


if __name__ == "__main__":
    B, T = 2, 16
    feat_dim = 32          # C (real wav2vec2 uses 256; small for the demo)
    k_steps = 3
    num_neg = 4
    softmax_weight = 0.1

    root = jax.random.PRNGKey(0)
    k_enc, k_ctx, k_params, k_sample = jax.random.split(root, 4)

    feat_enc = jax.random.normal(k_enc, (B, feat_dim, T), dtype=jnp.float32)
    feat_context = jax.random.normal(k_ctx, (B, feat_dim, T), dtype=jnp.float32)

    # Deterministic mask: 8 masked steps per batch (>= num_neg + 1).
    t_idx = jnp.arange(T)
    mask = jnp.stack([(t_idx % 2) == 0, (t_idx % 2) == 1], axis=0)   # (B, T) bool

    # float32 compute dtype here so the check against the f32 reference is exact;
    # production default is bfloat16.
    loss_mod = Wav2Vec2LossPallas(k_steps, num_neg, feat_dim, softmax_weight,
                                  param_key=k_params, compute_dtype=jnp.float32)
    loss = loss_mod(feat_enc, feat_context, mask, sample_key=k_sample)
    loss = jax.block_until_ready(loss)

    # Cross-check against a pure-JAX reference using the exact same gathered
    # rows and sampled negative indices (same key -> same samples).
    per_batch = loss_mod._gather_and_sample(feat_enc, feat_context, mask, k_sample)
    ref = jax.block_until_ready(_reference_loss(per_batch, softmax_weight))

    assert np.allclose(np.asarray(loss), np.asarray(ref),
                       rtol=1e-3, atol=1e-3), (loss, ref)
    print("KERNEL_OK")
</pallas_src>

<mosaic_0001>
module attributes {stable_mosaic.version = 11 : i64} {
  func.func @_w2v2_loss_kernel(%arg0: i32, %arg1: i32, %arg2: memref<1x8x32xf32, #tpu.memory_space<vmem>>, %arg3: memref<1x8x32xf32, #tpu.memory_space<vmem>>, %arg4: memref<1x8x8xi8, #tpu.memory_space<vmem>>, %arg5: memref<1x1x1x1xf32, #tpu.memory_space<vmem>>) attributes {dimension_semantics = [#tpu.dimension_semantics<parallel>, #tpu.dimension_semantics<parallel>], iteration_bounds = array<i64: 2, 1>, scalar_prefetch = 0 : i64, scratch_operands = 0 : i64, tpu.core_type = #tpu.core_type<tc>, window_params = [{transform_indices = @transform_0, window_bounds = array<i64: 1, 8, 32>}, {transform_indices = @transform_1, window_bounds = array<i64: 1, 8, 32>}, {transform_indices = @transform_2, window_bounds = array<i64: 1, 8, 8>}, {transform_indices = @transform_3, window_bounds = array<i64: 1, 1, 1, 1>}]} {
    %c0 = arith.constant 0 : index
    %c0_0 = arith.constant 0 : index
    %c0_1 = arith.constant 0 : index
    %0 = vector.load %arg2[%c0, %c0_0, %c0_1] : memref<1x8x32xf32, #tpu.memory_space<vmem>>, vector<1x8x32xf32>
    %1 = vector.shape_cast %0 : vector<1x8x32xf32> to vector<8x32xf32>
    %c0_2 = arith.constant 0 : index
    %c0_3 = arith.constant 0 : index
    %c0_4 = arith.constant 0 : index
    %2 = vector.load %arg3[%c0_2, %c0_3, %c0_4] : memref<1x8x32xf32, #tpu.memory_space<vmem>>, vector<1x8x32xf32>
    %3 = vector.shape_cast %2 : vector<1x8x32xf32> to vector<8x32xf32>
    %c0_5 = arith.constant 0 : index
    %c0_6 = arith.constant 0 : index
    %c0_7 = arith.constant 0 : index
    %4 = vector.load %arg4[%c0_5, %c0_6, %c0_7] : memref<1x8x8xi8, #tpu.memory_space<vmem>>, vector<1x8x8xi8>
    %5 = vector.shape_cast %4 : vector<1x8x8xi8> to vector<8x8xi8>
    %6 = arith.sitofp %5 : vector<8x8xi8> to vector<8x8xf32>
    %7 = arith.mulf %1, %1 : vector<8x32xf32>
    %cst = arith.constant dense<0.000000e+00> : vector<8xf32>
    %8 = vector.multi_reduction <add>, %7, %cst [1] : vector<8x32xf32> to vector<8xf32>
    %9 = vector.shape_cast %8 : vector<8xf32> to vector<8x1xf32>
    %cst_8 = arith.constant 1.000000e-30 : f32
    %10 = vector.broadcast %cst_8 : f32 to vector<8x1xf32>
    %11 = arith.maximumf %9, %10 : vector<8x1xf32>
    %12 = math.rsqrt %11 : vector<8x1xf32>
    %cst_9 = arith.constant 1.000000e+01 : f32
    %13 = vector.broadcast %cst_9 : f32 to vector<8x1xf32>
    %14 = arith.mulf %12, %13 : vector<8x1xf32>
    %15 = vector.broadcast %14 : vector<8x1xf32> to vector<8x32xf32>
    %16 = arith.mulf %1, %15 : vector<8x32xf32>
    %cst_10 = arith.constant dense<0.000000e+00> : vector<8x8xf32>
    %17 = tpu.matmul %16, %3, %cst_10 {dimension_numbers = #tpu.dot_dimension_numbers<[1], [1], [0], [0], [0, 0, 1, 0], [], []>} : vector<8x32xf32>, vector<8x32xf32>, vector<8x8xf32> -> vector<8x8xf32>
    %c8_i32 = arith.constant 8 : i32
    %18 = arith.muli %arg1, %c8_i32 : i32
    %19 = tpu.assume_multiple %18, 8 : i32
    %c0_11 = arith.constant 0 : index
    %20 = arith.index_cast %19 : i32 to index
    %c0_12 = arith.constant 0 : index
    %21 = vector.load %arg3[%c0_11, %20, %c0_12] : memref<1x8x32xf32, #tpu.memory_space<vmem>>, vector<1x8x32xf32>
    %22 = vector.shape_cast %21 : vector<1x8x32xf32> to vector<8x32xf32>
    %23 = arith.mulf %16, %22 : vector<8x32xf32>
    %cst_13 = arith.constant dense<0.000000e+00> : vector<8xf32>
    %24 = vector.multi_reduction <add>, %23, %cst_13 [1] : vector<8x32xf32> to vector<8xf32>
    %25 = vector.shape_cast %24 : vector<8xf32> to vector<8x1xf32>
    %cst_14 = arith.constant 1.000000e+01 : f32
    %26 = vector.broadcast %cst_14 : f32 to vector<8x8xf32>
    %27 = arith.subf %17, %26 : vector<8x8xf32>
    %28 = math.exp %27 : vector<8x8xf32>
    %29 = arith.mulf %28, %6 : vector<8x8xf32>
    %cst_15 = arith.constant dense<0.000000e+00> : vector<8xf32>
    %30 = vector.multi_reduction <add>, %29, %cst_15 [1] : vector<8x8xf32> to vector<8xf32>
    %31 = vector.shape_cast %30 : vector<8xf32> to vector<8x1xf32>
    %cst_16 = arith.constant 1.000000e+01 : f32
    %32 = vector.broadcast %cst_16 : f32 to vector<8x1xf32>
    %33 = arith.subf %25, %32 : vector<8x1xf32>
    %34 = math.exp %33 : vector<8x1xf32>
    %35 = arith.addf %34, %31 : vector<8x1xf32>
    %36 = math.log %35 : vector<8x1xf32>
    %cst_17 = arith.constant 1.000000e+01 : f32
    %37 = vector.broadcast %cst_17 : f32 to vector<8x1xf32>
    %38 = arith.addf %37, %36 : vector<8x1xf32>
    %cst_18 = arith.constant 0.000000e+00 : f32
    %39 = vector.broadcast %cst_18 : f32 to vector<8x1xf32>
    %40 = arith.cmpf ogt, %31, %39 : vector<8x1xf32>
    %41 = arith.subf %38, %25 : vector<8x1xf32>
    %cst_19 = arith.constant 0.000000e+00 : f32
    %42 = vector.broadcast %cst_19 : f32 to vector<8x1xf32>
    %43 = arith.select %40, %41, %42 : vector<8x1xi1>, vector<8x1xf32>
    %44 = vector.shape_cast %43 : vector<8x1xf32> to vector<1x8x1xf32>
    %cst_20 = arith.constant dense<0.000000e+00> : vector<1xf32>
    %45 = vector.multi_reduction <add>, %44, %cst_20 [1, 2] : vector<1x8x1xf32> to vector<1xf32>
    %46 = vector.shape_cast %45 : vector<1xf32> to vector<1x1x1xf32>
    %47 = vector.extract %46[0, 0, 0] : f32 from vector<1x1x1xf32>
    %48 = vector.broadcast %47 : f32 to vector<1x1xf32>
    %c0_21 = arith.constant 0 : index
    %c0_22 = arith.constant 0 : index
    %c0_23 = arith.constant 0 : index
    %c0_24 = arith.constant 0 : index
    %49 = vector.load %arg5[%c0_21, %c0_22, %c0_23, %c0_24] : memref<1x1x1x1xf32, #tpu.memory_space<vmem>>, vector<1x1x1x1xf32>
    %50 = vector.shape_cast %49 : vector<1x1x1x1xf32> to vector<1x1xf32>
    %51 = vector.shape_cast %48 : vector<1x1xf32> to vector<1x1x1x1xf32>
    tpu.vector_store %arg5[%c0_21, %c0_22, %c0_23, %c0_24], %51 {strides = array<i32>} : memref<1x1x1x1xf32, #tpu.memory_space<vmem>>, vector<1x1x1x1xf32>,
    return
  }
  func.func @transform_0(%arg0: i32, %arg1: i32) -> (i32, i32, i32) {
    %c0_i32 = arith.constant 0 : i32
    %c0_i32_0 = arith.constant 0 : i32
    return %arg0, %arg1, %c0_i32 : i32, i32, i32
  }
  func.func @transform_1(%arg0: i32, %arg1: i32) -> (i32, i32, i32) {
    %c0_i32 = arith.constant 0 : i32
    %c0_i32_0 = arith.constant 0 : i32
    %c0_i32_1 = arith.constant 0 : i32
    return %arg0, %c0_i32, %c0_i32_0 : i32, i32, i32
  }
  func.func @transform_2(%arg0: i32, %arg1: i32) -> (i32, i32, i32) {
    %c0_i32 = arith.constant 0 : i32
    %c0_i32_0 = arith.constant 0 : i32
    return %arg0, %arg1, %c0_i32 : i32, i32, i32
  }
  func.func @transform_3(%arg0: i32, %arg1: i32) -> (i32, i32, i32, i32) {
    %c0_i32 = arith.constant 0 : i32
    %c0_i32_0 = arith.constant 0 : i32
    %c0_i32_1 = arith.constant 0 : i32
    return %arg0, %arg1, %c0_i32, %c0_i32_0 : i32, i32, i32, i32
  }
}

</mosaic_0001>

<bundles_post_ra>
// kernel: tpu_custom_call.1
= control target key start
LH: loop header
LB: loop body
LE: loop exit
PB: predicated region body
PF: predicated region fallthrough
CT: control target
= control target key end

     0   :  { %8 = vsyncpa [#allocation3], 0  ;;  %s939_s0 = inlined_call_operand.hbm [shape: f32[2,8,32], index: 0, kind: input, shape index: {}]   ;;  %s940_s1 = inlined_call_operand.hbm [shape: f32[2,8,32], index: 1, kind: input, shape index: {}]   ;;  %s941_s2 = inlined_call_operand.vmem [shape: s8[2,8,8], index: 2, kind: input, shape index: {}]   ;;  %s942_s3 = inlined_call_operand.vmem [shape: f32[2,1,1,1], index: 3, kind: output, shape index: {}]  }
   0x1   :  { %10 = vsyncpa [#allocation3 + $0x1], 0 }
   0x2   :  { %11 = vsyncpa [#allocation5], 0 }
   0x3   :  { %13 = vsyncpa [#allocation5 + $0x1], 0  ;;  %s756_s12 = smov 0   ;;  %s758_s13 = smov 0  }
   0x4   :  { %s760_s14 = smov 0   ;;  %s762_s15 = smov 0  }
   0x5   :  { %s764_s16 = smov 0   ;;  %s766_s17 = smov 0  }
   0x6 LB: > { %s519_s18 = sadd.s32 4294967295, %s730_s17   ;;  %s31_s19 = sadd.s32 1, %s726_s16  ;;  %s730_s17 = sphi %s766_s17, %s19_s17   ;;  %s726_s16 = sphi %s764_s16, %s956_s16   ;;  %s722_s15 = sphi %s762_s15, %s955_s15   ;;  %s718_s14 = sphi %s760_s14, %s954_s14   ;;  %s714_s13 = sphi %s758_s13, %s953_s13   ;;  %s710_s12 = sphi %s756_s12, %s952_s12  }
   0x7   : > { %p33_p0 = scmp.ge.s32.totalorder %s31_s19, 2  ;;  %s40_s20 = sadd.s32 1, %s718_s14 }
   0x8   : > { %p47_p1 = scmp.ne.s32.totalorder %s718_s14, %s714_s13  ;;  %p48_p2 = scmp.eq.s32.totalorder %s730_s17, 0 }
   0x9   : > { %s958_s19 = smov (%p33_p0, %s31_s19), 0  ;;  %p53_p4 = scmp.ne.s32.totalorder %s714_s13, %s710_s12 }
   0xa   : > { %p792_p3 = por %p48_p2, %p47_p1  ;;  %s35_s22 = ssub.s32 %s726_s16, %s958_s19 }
   0xb   : > { %p54_p5 = scmp.eq.s32.totalorder %s519_s18, 0  ;;  %p38_p6 = scmp.eq.s32.totalorder %s35_s22, 0 }
   0xc   : > { %p557_p8 = scmp.lt.s32.totalorder %s730_s17, 2  ;;  %s808_s25 = sand.u32 1, %s718_s14  }
   0xd   : > { %p799_p7 = por %p54_p5, %p53_p4  ;;  %s524_s26 = sshll.u32 %s726_s16, 7 }
   0xe   : > { %s805_s24 = scalar_select %p38_p6, %s718_s14, %s40_s20  }
   0xf   : > { %s945_s23 = scalar_select %p799_p7, 1, 0 }
  0x10   : > { %s523_s27 = sshll.u32 %s808_s25, 3  ;;  %s817_s30 = scalar_lea.hbm %s939_s0, %s524_s26 }
  0x11   : > { %s163_s4 = scalar_lea.vmem [#allocation2], %s523_s27  ;;  %p823_p9 = pnand %p557_p8, %p792_p3 }
  0x12   : > { %s171_s5 = sshll.u32 %s163_s4, 4  ;;  %s160_s7 = scalar_lea.sflag [#allocation3], %s808_s25  ;;  %s827_s5 = int_to_ptr.vmem [resolvable:$true] %s171_s5 }
  0x13   : > { %s616_s8 = scalar_lea.hbm %s817_s30, 128  ;;  %p618_p13 = pneg %p823_p9 }
  0x14   : > { %p617_p12 = scmp.ne.s32.totalorder %s817_s30, %s616_s8  ;;  %s621_s11 = scalar_lea.hbm %s939_s0, 256 }
  0x15   : > { %p622_p2 = scmp.lt.u32.totalorder %s817_s30, %s939_s0  ;;  %p623_p3 = scmp.lt.u32.totalorder %s621_s11, %s616_s8 }
  0x16   : > { %p619_p0 = pnand %p618_p13, %p617_p12  ;;  %p625_p5 = scmp.lt.u32.totalorder %s616_s8, %s817_s30 }
  0x17   : > { %p624_p4 = por %p623_p3, %p622_p2 }
  0x18   : > { %p620_p1 = pneg %p619_p0 }
  0x19   : > { %p626_p6 = por %p625_p5, %p624_p4 }
  0x1b   : > { %p627_p8 = pnand %p626_p6, %p620_p1 }
  0x1d   : > { %630 = shalt.err (!%p627_p8)
}
  0x1e   : > { %s631_s20 = scalar_lea.vmem %s827_s5, 128  ;;  %s732_s21 = smov [#allocation2]  }
  0x1f   : > { %p632_p12 = scmp.ne.s32.totalorder %s827_s5, %s631_s20  ;;  %s636_s22 = sshll.u32 %s732_s21, 4  ;;  %s637_s22 = int_to_ptr.vmem [resolvable:$false] %s636_s22 }
  0x20   : > { %s638_s28 = scalar_lea.vmem %s637_s22, 256  ;;  %p639_p11 = scmp.lt.s32.totalorder %s827_s5, %s637_s22 }
  0x21   : > { %p634_p0 = pnand %p632_p12, %p618_p13  ;;  %p640_p2 = scmp.lt.s32.totalorder %s638_s28, %s631_s20 }
  0x23   : > { %p635_p10 = pneg %p634_p0  ;;  %p641_p3 = por %p640_p2, %p639_p11 }
  0x25   : > { %p642_p4 = pnand %p641_p3, %p635_p10 }
  0x27   : > { %645 = shalt.err (!%p642_p4)
}
  0x28   : > { %553 = dma.hbm_to_vmem [thread:$0]  (!%p823_p9), %s817_s30, 128, %s827_s5, %s160_s7  }
  0x29   : > { %p947_p1 = scmp.lt.s32.totalorder %s730_s17, 3  ;;  %p948_p5 = scmp.ge.s32.totalorder %s730_s17, 1 }
  0x2a   : > { %s870_s9 = scalar_lea.hbm %s940_s1, %s524_s26  ;;  %s182_s10 = scalar_lea.vmem [#allocation4], %s523_s27 }
  0x2b   : > { %p861_p6 = pnand %p948_p5, %p947_p1  ;;  %s189_s11 = sshll.u32 %s182_s10, 4  ;;  %s190_s11 = int_to_ptr.vmem [resolvable:$true] %s189_s11 }
  0x2c   : > { %s179_s30 = scalar_lea.sflag [#allocation5], %s808_s25  ;;  %s646_s5 = scalar_lea.hbm %s870_s9, 128 }
  0x2d   : > { %s949_s29 = scalar_select %p861_p6, 1, 0 }
  0x2e   : > { %p647_p10 = scmp.ne.s32.totalorder %s870_s9, %s646_s5  ;;  %s651_s26 = scalar_lea.hbm %s940_s1, 256 }
  0x2f   : > { %p652_p12 = scmp.lt.u32.totalorder %s870_s9, %s940_s1  ;;  %p653_p0 = scmp.lt.u32.totalorder %s651_s26, %s646_s5 }
  0x30   : > { %p649_p11 = pnand %p647_p10, %p618_p13  ;;  %p655_p3 = scmp.lt.u32.totalorder %s646_s5, %s870_s9 }
  0x31   : > { %p654_p2 = por %p653_p0, %p652_p12 }
  0x32   : > { %p650_p8 = pneg %p649_p11 }
  0x33   : > { %p656_p4 = por %p655_p3, %p654_p2 }
  0x35   : > { %p657_p1 = pnand %p656_p4, %p650_p8 }
  0x37   : > { %660 = shalt.err (!%p657_p1)
}
  0x38   : > { %s661_s25 = scalar_lea.vmem %s190_s11, 128  ;;  %s733_s27 = smov [#allocation4]  }
  0x39   : > { %p662_p5 = scmp.ne.s32.totalorder %s190_s11, %s661_s25  ;;  %s666_s21 = sshll.u32 %s733_s27, 4  ;;  %s667_s21 = int_to_ptr.vmem [resolvable:$false] %s666_s21 }
  0x3a   : > { %s668_s22 = scalar_lea.vmem %s667_s21, 256  ;;  %p669_p7 = scmp.lt.s32.totalorder %s190_s11, %s667_s21 }
  0x3b   : > { %p664_p10 = pnand %p662_p5, %p618_p13  ;;  %p670_p6 = scmp.lt.s32.totalorder %s668_s22, %s661_s25 }
  0x3d   : > { %p665_p11 = pneg %p664_p10  ;;  %p671_p0 = por %p670_p6, %p669_p7 }
  0x3f   : > { %p672_p12 = pnand %p671_p0, %p665_p11 }
  0x41   : > { %675 = shalt.err (!%p672_p12)
}
  0x42   : > { %556 = dma.hbm_to_vmem [thread:$0]  (!%p823_p9), %s870_s9, 128, %s190_s11, %s179_s30  }
  0x43   : > { %p950_p8 = scmp.ne.s32.totalorder %s949_s29, 0 }
  0x44   : > { %s210_s28 = sand.u32 (!%p950_p8), 1, %s714_s13   ;;  %p951_p13 = scmp.ne.s32.totalorder (!%p950_p8), %s945_s23, 0 }
  0x45   : > { %208 = sbr.rel (%p950_p8) target bundleno = 841 (0x349), region = 32  ;;  %s528_s4 = sshll.u32 (!%p950_p8), %s210_s28, 3 }
  0x46   : > { %s211_s8 = scalar_lea.sflag (!%p950_p8), [#allocation3], %s210_s28  ;;  %s214_s10 = scalar_lea.vmem (!%p950_p8), [#allocation2], %s528_s4 }
  0x4c   : > { %701 = dma.done.wait (%p951_p13), %s211_s8, 128  }
  0x4d   : > { %703 = vsyncadd (%p951_p13), %s211_s8, 4294967168  ;;  %s220_s5 = scalar_lea.sflag [#allocation5], %s210_s28  ;;  %s223_s7 = scalar_lea.vmem [#allocation4], %s528_s4 }
  0x4e   : > { %705 = dma.done.wait (%p951_p13), %s220_s5, 128  }
  0x4f   : > { %707 = vsyncadd (%p951_p13), %s220_s5, 4294967168  ;;  %v272_v0 = vld [vmem:[%s214_s10] sm:$0xff]  ;;  %vm278_vm0 = vcmask 261120   ;;  %v734_v3 = vmov 0.0   ;;  %v273_v4 = vld [vmem:[%s223_s7] sm:$0xff]  ;;  %vm735_vm1 = vmmov 0  }
  0x50   : > { %v277_v1 = vmul.f32 %v272_v0, %v272_v0  ;;  %539 = vmatprep.subr.mxu0 %v734_v3  ;;  %541 = vmatprep.mubr.msk.f32.mxu0 %vm735_vm1, %v734_v3  ;;  %p259_p7 = scmp.lt.s32.totalorder %s722_s15, 1  ;;  %vm373_vm2 = vcmask 64512   ;;  %vm387_vm3 = vcmask 7168   ;;  %vm399_vm5 = vcmask 0  }
  0x51   : > { %540 = vmatpush3.xpose.msk.msra.mxu0 %vm278_vm0, %v273_v4 }
  0x52   : > { %v279_v2 = vsel %vm278_vm0, %v277_v1, 0.0  ;;  %s960_s15 = smov (!%p259_p7, %s722_s15), 1 }
  0x53   : > { %280 = vadd.xlane.f32.xlu0 %v279_v2  ;;  %s530_s23 = sshll.u32 %s960_s15, 1  ;;  %s271_s12 = scalar_lea.vmem %s942_s3, %s960_s15 }
  0x54   : > { %s265_s9 = scalar_lea.vmem %s941_s2, %s530_s23 }
  0x55   : > { %v274_v16 = vld [vmem:[%s265_s9] sm:$0x3] }
  0x56   : > { %v275_v17 = vunpack.c.0.s8 %v274_v16 }
  0x58   : > { %v276_v18 = vcvt.s32.f32 %v275_v17 }
  0xe0   : > { %v281_v5 = vpop.xlane.xlu0 %280 }
  0xe1   : > { %v282_v6 = vmax.f32 %v281_v5, 1e-30 }
  0xe3   : > { %608 = vrsqrt.f32 %v282_v6 }
  0xed   : > { %v609_v7 = vpop.eup %608 }
  0xee   : > { %v284_v8 = vmul.f32 10.0, %v609_v7 }
  0xf0   : > { %v285_v9 = vmul.f32 %v284_v8, %v272_v0 }
  0xf2   : > { %542 = vmatmul.mubr.msk.f32.vlgmr.msra.gmra.mrb[0].mxu0 %vm278_vm0, %v285_v9  ;;  %v365_v10 = vmul.f32 %v285_v9, %v273_v4 }
  0xf4   : > { %v366_v11 = vsel %vm278_vm0, %v365_v10, 0.0 }
  0xf5   : > { %367 = vadd.xlane.f32.xlu0 %v366_v11 }
 0x182   : > { %v368_v22 = vpop.xlane.xlu0 %367 }
 0x183   : > { %v534_v23 = vadd.f32 -10.0, %v368_v22 }
 0x185   : > { %v378_v24 = vmul.f32 1.442695, %v534_v23 }
 0x1c5   : > { %v358_v12 = vpop.f32.mrb[0].mxu0 }
 0x1c6   : > { %v533_v13 = vadd.f32 -10.0, %v358_v12  ;;  %v543_v14 = vpop.f32.mrb[1].mxu0 }
 0x1c8   : > { %v370_v15 = vmul.f32 1.442695, %v533_v13 }
 0x1ca   : > { %610 = vpow2.f32 %v370_v15 }
 0x1cb   : > { %612 = vpow2.f32 %v378_v24 }
 0x1d4   : > { %v611_v19 = vpop.eup %610 }
 0x1d5   : > { %v372_v20 = vmul.f32 %v611_v19, %v276_v18  ;;  %v613_v25 = vpop.eup %612 }
 0x1d7   : > { %v374_v21 = vsel %vm373_vm2, %v372_v20, 0.0 }
 0x1d8   : > { %375 = vadd.xlane.f32.xlu1 %v374_v21 }
 0x265   : > { %v376_v26 = vpop.xlane.xlu1 %375 }
 0x266   : > { %v380_v27 = vadd.f32 %v613_v25, %v376_v26  ;;  %vm384_vm4 = vcmp.gt.f32.partialorder %v376_v26, 0.0 }
 0x268   : > { %614 = vlog2.f32 %v380_v27 }
 0x272   : > { %v615_v28 = vpop.eup %614 }
 0x273   : > { %v382_v29 = vmul.f32 0.6931472, %v615_v28 }
 0x275   : > { %v383_v30 = vadd.f32 10.0, %v382_v29 }
 0x277   : > { %v385_v31 = vsub.f32 %v383_v30, %v368_v22 }
 0x279   : > { %v386_v32 = vsel %vm384_vm4, %v385_v31, 0.0 }
 0x27a   : > { %v388_v33 = vsel %vm387_vm3, %v386_v32, 0.0 }
 0x27b   : > { %389 = vadd.xlane.f32.xlu1 %v388_v33 }
 0x308   : > { %v390_v34 = vpop.xlane.xlu1 %389 }
 0x309   : > { %v391_v35 = vrot.slane %v390_v34, 4 }
 0x30b   : > { %v392_v36 = vadd.f32 %v391_v35, %v390_v34 }
 0x30d   : > { %v393_v37 = vrot.slane %v392_v36, 2 }
 0x30f   : > { %v394_v38 = vadd.f32 %v393_v37, %v392_v36 }
 0x311   : > { %v395_v39 = vrot.slane %v394_v38, 1 }
 0x313   : > { %v396_v40 = vadd.f32 %v395_v39, %v394_v38 }
 0x315   : > { %544 = vpush %v396_v40 }
 0x346   : > { %s545_s26 = spop %544 }
 0x347   : > { %v398_v41 = vstv %s545_s26 }
 0x348   : > { %400 = vst.msk [vmem:[%s271_s12] sm:$0x1] %vm399_vm5, %v398_v41 }
 0x349 PF: > { %s19_s17 = sadd.s32 1, %s730_s17   ;;  %s952_s12 = smov %s714_s13 }
 0x34a   : > { %p16_p9 = scmp.ge.s32.totalorder %s19_s17, 4   ;;  %s953_s13 = smov %s718_s14 }
 0x34b   : > { %s954_s14 = smov %s805_s24  ;;  %s955_s15 = smov %s726_s16 }
 0x34c   : > { %s956_s16 = smov %s958_s19  ;;  %18 = sbr.rel (!%p16_p9) target bundleno = 6 (0x6), region = 89 }
 0x353   :  { %424 = vsyncpa [#allocation3], 1 }
 0x354   :  { %426 = vsyncpa [#allocation3 + $0x1], 1 }
 0x355   :  { %427 = vsyncpa [#allocation5], 1 }
 0x356   :  { %429 = vsyncpa [#allocation5 + $0x1], 1 }

</bundles_post_ra>
